<compile_context>
chip_gen: v7x
topology: tpu7x:2x2x1
jax: 0.10.0
libtpu: 0.0.40
codegen_flags: <defaults>
</compile_context>

<pallas_src>
import functools

import jax
import jax.numpy as jnp
from jax.experimental import pallas as pl
from jax.experimental.pallas import tpu as pltpu


# ----------------------------------------------------------------------------
# Pallas kernel: one GCN layer, row-tiled.
#   out[i-tile] = act( dinv_i * ( sum_k A[i,k] @ (dinv_k * feat[k]) ) @ W + b )
# Grid = (row tiles, k tiles); k is the reduction axis (last, "arbitrary").
# ----------------------------------------------------------------------------
def gcn_layer_kernel(a_ref, feat_ref, dinv_row_ref, dinv_col_ref, w_ref, b_ref,
                     out_ref, acc_ref, *, activation):
    k = pl.program_id(1)

    @pl.when(k == 0)
    def _init():
        acc_ref[...] = jnp.zeros_like(acc_ref)

    # Scale feature rows by D^{-1/2} of their source nodes (cheap VPU work,
    # hidden under the MXU), then feed the MXU in bf16 with f32 accumulation.
    feat = feat_ref[...].astype(jnp.float32) * dinv_col_ref[...]
    acc_ref[...] += jnp.dot(a_ref[...], feat.astype(jnp.bfloat16),
                            preferred_element_type=jnp.float32)

    @pl.when(k == pl.num_programs(1) - 1)
    def _finalize():
        z = (acc_ref[...] * dinv_row_ref[...]).astype(jnp.bfloat16)
        y = jnp.dot(z, w_ref[...], preferred_element_type=jnp.float32)
        y = y + b_ref[...]
        if activation:
            y = jnp.maximum(y, 0.0)
        # TODO(synk): torch.nn.Dropout(0.2) in train mode is stochastic;
        # eval-mode (identity) semantics are used here.
        out_ref[...] = y.astype(out_ref.dtype)


def gcn_layer(a, feat, dinv, w, b, *, out_dtype, activation, tile):
    n_pad = a.shape[0]
    f_pad = feat.shape[1]
    o_pad = w.shape[1]
    tm = tk = tile
    grid = (n_pad // tm, n_pad // tk)

    kernel = functools.partial(gcn_layer_kernel, activation=activation)
    return pl.pallas_call(
        kernel,
        out_shape=jax.ShapeDtypeStruct((n_pad, o_pad), out_dtype),
        grid_spec=pltpu.PrefetchScalarGridSpec(
            num_scalar_prefetch=0,
            grid=grid,
            in_specs=[
                pl.BlockSpec((tm, tk), lambda i, k: (i, k)),        # A (streamed)
                pl.BlockSpec((tk, f_pad), lambda i, k: (k, 0)),     # features
                pl.BlockSpec((tm, 1), lambda i, k: (i, 0)),         # dinv (rows)
                pl.BlockSpec((tk, 1), lambda i, k: (k, 0)),         # dinv (cols)
                pl.BlockSpec((f_pad, o_pad), lambda i, k: (0, 0)),  # W (resident)
                pl.BlockSpec((1, o_pad), lambda i, k: (0, 0)),      # bias
            ],
            out_specs=pl.BlockSpec((tm, o_pad), lambda i, k: (i, 0)),
            scratch_shapes=[pltpu.VMEM((tm, f_pad), jnp.float32)],
        ),
        compiler_params=pltpu.CompilerParams(
            dimension_semantics=("parallel", "arbitrary"),
            vmem_limit_bytes=32 * 1024 * 1024,
        ),
    )(a, feat, dinv, dinv, w, b)


# ----------------------------------------------------------------------------
# Glue (plain JAX, not the hot path): dense weighted adjacency + D^{-1/2}.
# ----------------------------------------------------------------------------
def _round_up(x, m):
    return ((x + m - 1) // m) * m


def _pad2(m, rows, cols):
    out = jnp.zeros((rows, cols), m.dtype)
    return out.at[: m.shape[0], : m.shape[1]].set(m)


def build_adjacency(edge_index, edge_attr, num_nodes, n_pad):
    """A[dst, src] = w (bf16, zero-padded to n_pad) and D^{-1/2} (f32, [n_pad,1])."""
    src = edge_index[0]
    dst = edge_index[1]
    a = jnp.zeros((n_pad, n_pad), jnp.float32)
    a = a.at[dst, src].add(edge_attr.astype(jnp.float32))
    # add_remaining_self_loops: weight-1 self loop only where none exists.
    idx = jnp.arange(num_nodes)
    diag = a[idx, idx]
    a = a.at[idx, idx].set(jnp.where(diag == 0.0, 1.0, diag))
    deg = jnp.sum(a, axis=1, keepdims=True)                       # [n_pad, 1]
    dinv = jnp.where(deg > 0.0, jax.lax.rsqrt(deg), 0.0)
    return a.astype(jnp.bfloat16), dinv.astype(jnp.float32)


# ----------------------------------------------------------------------------
# Forward wrapper: padding + two pallas_call layers.
# ----------------------------------------------------------------------------
def encoder_gae_forward(x, edge_index, edge_attr, params, *, tile=256):
    w1, b1, w2_mu, b2_mu = params
    n, f_in = x.shape
    hidden_dim = w1.shape[1]
    latent_dim = w2_mu.shape[1]

    n_pad = _round_up(n, tile)
    f_pad = _round_up(f_in, 128)
    h_pad = _round_up(hidden_dim, 128)
    l_pad = _round_up(latent_dim, 128)

    a_bf16, dinv = build_adjacency(edge_index, edge_attr, n, n_pad)

    x_p = jnp.zeros((n_pad, f_pad), jnp.float32).at[:n, :f_in].set(
        x.astype(jnp.float32))
    w1_p = _pad2(w1.astype(jnp.float32), f_pad, h_pad).astype(jnp.bfloat16)
    b1_p = _pad2(jnp.reshape(b1, (1, -1)).astype(jnp.float32), 1, h_pad)
    w2_p = _pad2(w2_mu.astype(jnp.float32), h_pad, l_pad).astype(jnp.bfloat16)
    b2_p = _pad2(jnp.reshape(b2_mu, (1, -1)).astype(jnp.float32), 1, l_pad)

    # Layer 1: hidden = relu(A_hat @ X @ W1 + b1)   (bf16 output feeds layer 2)
    h = gcn_layer(a_bf16, x_p, dinv, w1_p, b1_p,
                  out_dtype=jnp.bfloat16, activation=True, tile=tile)
    # Layer 2 (mu head): mu = A_hat @ H @ W2 + b2
    mu_pad = gcn_layer(a_bf16, h, dinv, w2_p, b2_p,
                       out_dtype=jnp.float32, activation=False, tile=tile)
    return mu_pad[:n, :latent_dim]


def init_params(key, input_dim, hidden_dim, latent_dim):
    """Glorot-uniform weights (as PyG GCNConv), zero biases, float32."""
    k1, k2 = jax.random.split(key, 2)

    def glorot(k, fan_in, fan_out):
        limit = jnp.sqrt(6.0 / (fan_in + fan_out))
        return jax.random.uniform(k, (fan_in, fan_out), jnp.float32, -limit, limit)

    w1 = glorot(k1, input_dim, hidden_dim)
    b1 = jnp.zeros((1, hidden_dim), jnp.float32)
    w2_mu = glorot(k2, hidden_dim, latent_dim)
    b2_mu = jnp.zeros((1, latent_dim), jnp.float32)
    return w1, b1, w2_mu, b2_mu


def reference_forward(x, edge_index, edge_attr, params):
    """Pure-JAX f32 reference of the PyTorch module's forward (eval mode)."""
    w1, b1, w2, b2 = params
    n = x.shape[0]
    src, dst = edge_index[0], edge_index[1]
    a = jnp.zeros((n, n), jnp.float32).at[dst, src].add(edge_attr)
    idx = jnp.arange(n)
    diag = a[idx, idx]
    a = a.at[idx, idx].set(jnp.where(diag == 0.0, 1.0, diag))
    deg = jnp.sum(a, axis=1)
    dinv = jnp.where(deg > 0.0, 1.0 / jnp.sqrt(deg), 0.0)
    a_hat = dinv[:, None] * a * dinv[None, :]
    h = jnp.maximum(a_hat @ (x @ w1) + b1, 0.0)
    return a_hat @ (h @ w2) + b2


if __name__ == "__main__":
    key = jax.random.PRNGKey(0)
    kx, ke, kw, kwgt = jax.random.split(key, 4)

    # Small synthetic graph consistent with the module's forward signature.
    num_nodes = 16
    num_edges = 40
    input_dim, hidden_dim, latent_dim = 8, 32, 16

    x = jax.random.normal(kx, (num_nodes, input_dim), jnp.float32)

    # Random edges without self-loops (remaining self-loops added in the glue).
    src = jax.random.randint(ke, (num_edges,), 0, num_nodes)
    dst = (src + 1 + jax.random.randint(kw, (num_edges,), 0, num_nodes - 1)) % num_nodes
    edge_index = jnp.stack([src, dst], axis=0).astype(jnp.int32)   # [2, E]
    edge_attr = jax.random.uniform(kwgt, (num_edges,), jnp.float32, 0.1, 1.0)

    params = init_params(key, input_dim, hidden_dim, latent_dim)

    mu = encoder_gae_forward(x, edge_index, edge_attr, params)
    jax.block_until_ready(mu)
    assert mu.shape == (num_nodes, latent_dim) and mu.dtype == jnp.float32

    mu_ref = reference_forward(x, edge_index, edge_attr, params)
    err = float(jnp.max(jnp.abs(mu - mu_ref)))
    assert err < 0.1, f"mismatch vs f32 reference: {err}"

    print("KERNEL_OK")
</pallas_src>

<mosaic_0001>
module attributes {stable_mosaic.version = 11 : i64} {
  func.func @gcn_layer_kernel(%arg0: i32, %arg1: i32, %arg2: memref<256x256xbf16, #tpu.memory_space<vmem>>, %arg3: memref<256x128xf32, #tpu.memory_space<vmem>>, %arg4: memref<256x1xf32, #tpu.memory_space<vmem>>, %arg5: memref<256x1xf32, #tpu.memory_space<vmem>>, %arg6: memref<128x128xbf16, #tpu.memory_space<vmem>>, %arg7: memref<1x128xf32, #tpu.memory_space<vmem>>, %arg8: memref<256x128xbf16, #tpu.memory_space<vmem>>, %arg9: memref<256x128xf32, #tpu.memory_space<vmem>>) attributes {dimension_semantics = [#tpu.dimension_semantics<parallel>, #tpu.dimension_semantics<arbitrary>], iteration_bounds = array<i64: 1, 1>, scalar_prefetch = 0 : i64, scratch_operands = 1 : i64, tpu.core_type = #tpu.core_type<tc>, window_params = [{transform_indices = @transform_0, window_bounds = array<i64: 256, 256>}, {transform_indices = @transform_1, window_bounds = array<i64: 256, 128>}, {transform_indices = @transform_2, window_bounds = array<i64: 256, 1>}, {transform_indices = @transform_3, window_bounds = array<i64: 256, 1>}, {pipeline_mode = #tpu.pipeline_mode<synchronous>, transform_indices = @transform_4, window_bounds = array<i64: 128, 128>}, {pipeline_mode = #tpu.pipeline_mode<synchronous>, transform_indices = @transform_5, window_bounds = array<i64: 1, 128>}, {transform_indices = @transform_6, window_bounds = array<i64: 256, 128>}]} {
    %c0_i32 = arith.constant 0 : i32
    %0 = arith.cmpi eq, %arg1, %c0_i32 : i32
    %1 = arith.extui %0 : i1 to i32
    %c0_i32_0 = arith.constant 0 : i32
    %2 = arith.cmpi ne, %1, %c0_i32_0 : i32
    scf.if %2 {
      %cst_12 = arith.constant 0.000000e+00 : f32
      %16 = vector.broadcast %cst_12 : f32 to vector<256x128xf32>
      %c0_13 = arith.constant 0 : index
      %c0_14 = arith.constant 0 : index
      %17 = vector.load %arg9[%c0_13, %c0_14] : memref<256x128xf32, #tpu.memory_space<vmem>>, vector<256x128xf32>
      tpu.vector_store %arg9[%c0_13, %c0_14], %16 {strides = array<i32>} : memref<256x128xf32, #tpu.memory_space<vmem>>, vector<256x128xf32>,
    } else {
    }
    %c0 = arith.constant 0 : index
    %c0_1 = arith.constant 0 : index
    %3 = vector.load %arg3[%c0, %c0_1] : memref<256x128xf32, #tpu.memory_space<vmem>>, vector<256x128xf32>
    %c0_2 = arith.constant 0 : index
    %c0_3 = arith.constant 0 : index
    %4 = vector.load %arg5[%c0_2, %c0_3] : memref<256x1xf32, #tpu.memory_space<vmem>>, vector<256x1xf32>
    %5 = vector.broadcast %4 : vector<256x1xf32> to vector<256x128xf32>
    %6 = arith.mulf %3, %5 : vector<256x128xf32>
    %c0_4 = arith.constant 0 : index
    %c0_5 = arith.constant 0 : index
    %7 = vector.load %arg9[%c0_4, %c0_5] : memref<256x128xf32, #tpu.memory_space<vmem>>, vector<256x128xf32>
    %c0_6 = arith.constant 0 : index
    %c0_7 = arith.constant 0 : index
    %8 = vector.load %arg2[%c0_6, %c0_7] : memref<256x256xbf16, #tpu.memory_space<vmem>>, vector<256x256xbf16>
    %9 = arith.truncf %6 : vector<256x128xf32> to vector<256x128xbf16>
    %cst = arith.constant dense<0.000000e+00> : vector<256x128xf32>
    %10 = tpu.matmul %8, %9, %cst {dimension_numbers = #tpu.dot_dimension_numbers<[1], [0], [0], [1], [0, 0, 1, 1], [], []>} : vector<256x256xbf16>, vector<256x128xbf16>, vector<256x128xf32> -> vector<256x128xf32>
    %11 = arith.addf %7, %10 : vector<256x128xf32>
    %c0_8 = arith.constant 0 : index
    %c0_9 = arith.constant 0 : index
    %12 = vector.load %arg9[%c0_8, %c0_9] : memref<256x128xf32, #tpu.memory_space<vmem>>, vector<256x128xf32>
    tpu.vector_store %arg9[%c0_8, %c0_9], %11 {strides = array<i32>} : memref<256x128xf32, #tpu.memory_space<vmem>>, vector<256x128xf32>,
    %c0_i32_10 = arith.constant 0 : i32
    %13 = arith.cmpi eq, %arg1, %c0_i32_10 : i32
    %14 = arith.extui %13 : i1 to i32
    %c0_i32_11 = arith.constant 0 : i32
    %15 = arith.cmpi ne, %14, %c0_i32_11 : i32
    scf.if %15 {
      %c0_12 = arith.constant 0 : index
      %c0_13 = arith.constant 0 : index
      %16 = vector.load %arg9[%c0_12, %c0_13] : memref<256x128xf32, #tpu.memory_space<vmem>>, vector<256x128xf32>
      %c0_14 = arith.constant 0 : index
      %c0_15 = arith.constant 0 : index
      %17 = vector.load %arg4[%c0_14, %c0_15] : memref<256x1xf32, #tpu.memory_space<vmem>>, vector<256x1xf32>
      %18 = vector.broadcast %17 : vector<256x1xf32> to vector<256x128xf32>
      %19 = arith.mulf %16, %18 : vector<256x128xf32>
      %20 = arith.truncf %19 : vector<256x128xf32> to vector<256x128xbf16>
      %c0_16 = arith.constant 0 : index
      %c0_17 = arith.constant 0 : index
      %21 = vector.load %arg6[%c0_16, %c0_17] : memref<128x128xbf16, #tpu.memory_space<vmem>>, vector<128x128xbf16>
      %cst_18 = arith.constant dense<0.000000e+00> : vector<256x128xf32>
      %22 = tpu.matmul %20, %21, %cst_18 {dimension_numbers = #tpu.dot_dimension_numbers<[1], [0], [0], [1], [0, 0, 1, 1], [], []>} : vector<256x128xbf16>, vector<128x128xbf16>, vector<256x128xf32> -> vector<256x128xf32>
      %c0_19 = arith.constant 0 : index
      %c0_20 = arith.constant 0 : index
      %23 = vector.load %arg7[%c0_19, %c0_20] : memref<1x128xf32, #tpu.memory_space<vmem>>, vector<1x128xf32>
      %24 = vector.broadcast %23 : vector<1x128xf32> to vector<256x128xf32>
      %25 = arith.addf %22, %24 : vector<256x128xf32>
      %cst_21 = arith.constant 0.000000e+00 : f32
      %26 = vector.broadcast %cst_21 : f32 to vector<256x128xf32>
      %27 = arith.maximumf %25, %26 : vector<256x128xf32>
      %28 = arith.truncf %27 : vector<256x128xf32> to vector<256x128xbf16>
      %c0_22 = arith.constant 0 : index
      %c0_23 = arith.constant 0 : index
      %29 = vector.load %arg8[%c0_22, %c0_23] : memref<256x128xbf16, #tpu.memory_space<vmem>>, vector<256x128xbf16>
      tpu.vector_store %arg8[%c0_22, %c0_23], %28 {strides = array<i32>} : memref<256x128xbf16, #tpu.memory_space<vmem>>, vector<256x128xbf16>,
    } else {
    }
    return
  }
  func.func @transform_0(%arg0: i32, %arg1: i32) -> (i32, i32) {
    %c0_i32 = arith.constant 0 : i32
    return %arg0, %arg1 : i32, i32
  }
  func.func @transform_1(%arg0: i32, %arg1: i32) -> (i32, i32) {
    %c0_i32 = arith.constant 0 : i32
    %c0_i32_0 = arith.constant 0 : i32
    return %arg1, %c0_i32 : i32, i32
  }
  func.func @transform_2(%arg0: i32, %arg1: i32) -> (i32, i32) {
    %c0_i32 = arith.constant 0 : i32
    %c0_i32_0 = arith.constant 0 : i32
    return %arg0, %c0_i32 : i32, i32
  }
  func.func @transform_3(%arg0: i32, %arg1: i32) -> (i32, i32) {
    %c0_i32 = arith.constant 0 : i32
    %c0_i32_0 = arith.constant 0 : i32
    return %arg1, %c0_i32 : i32, i32
  }
  func.func @transform_4(%arg0: i32, %arg1: i32) -> (i32, i32) {
    %c0_i32 = arith.constant 0 : i32
    %c0_i32_0 = arith.constant 0 : i32
    %c0_i32_1 = arith.constant 0 : i32
    return %c0_i32, %c0_i32_0 : i32, i32
  }
  func.func @transform_5(%arg0: i32, %arg1: i32) -> (i32, i32) {
    %c0_i32 = arith.constant 0 : i32
    %c0_i32_0 = arith.constant 0 : i32
    %c0_i32_1 = arith.constant 0 : i32
    return %c0_i32, %c0_i32_0 : i32, i32
  }
  func.func @transform_6(%arg0: i32, %arg1: i32) -> (i32, i32) {
    %c0_i32 = arith.constant 0 : i32
    %c0_i32_0 = arith.constant 0 : i32
    return %arg0, %c0_i32 : i32, i32
  }
}

</mosaic_0001>

<bundles_post_ra>
// kernel: tpu_custom_call.1
= control target key start
LH: loop header
LB: loop body
LE: loop exit
PB: predicated region body
PF: predicated region fallthrough
CT: control target
= control target key end

     0   :  { %11 = vsyncpa [#allocation4], 0  ;;  %s2610_s0 = inlined_call_operand.vmem [shape: bf16[256,256], index: 0, kind: input, shape index: {}]   ;;  %s2611_s1 = inlined_call_operand.vmem [shape: f32[256,128], index: 1, kind: input, shape index: {}]   ;;  %s2612_s2 = inlined_call_operand.vmem [shape: f32[256,1], index: 2, kind: input, shape index: {}]   ;;  %s2613_s3 = inlined_call_operand.vmem [shape: f32[256,1], index: 3, kind: input, shape index: {}]   ;;  %s2614_s4 = inlined_call_operand.hbm [shape: bf16[128,128], index: 4, kind: input, shape index: {}]   ;;  %s2615_s5 = inlined_call_operand.vmem [shape: f32[1,128], index: 5, kind: input, shape index: {}]   ;;  %s2616_s6 = inlined_call_operand.hbm [shape: bf16[256,128], index: 6, kind: output, shape index: {}]  }
   0x1   :  { %12 = vsyncpa [#allocation5], 0  ;;  %s2023_s21 = smov [#allocation3]   ;;  %s1975_s25 = scalar_lea.hbm %s2614_s4, 1024 }
   0x2   :  { %s26_s22 = sshll.u32 %s2023_s21, 4  ;;  %p1976_p0 = scmp.ne.s32.totalorder %s2614_s4, %s1975_s25  ;;  %s27_s22 = int_to_ptr.vmem [resolvable:$true] %s26_s22 }
   0x3   :  { %p1979_p1 = scmp.lt.u32.totalorder %s1975_s25, %s2614_s4 }
   0x5   :  { %p1981_p2 = pnand %p1979_p1, %p1976_p0 }
   0x7   :  { %1984 = shalt.err (!%p1981_p2)
}
   0x8   :  { %s1985_s30 = scalar_lea.vmem %s27_s22, 1024  ;;  %p1990_p4 = scmp.lt.s32.totalorder %s27_s22, %s27_s22 }
   0x9   :  { %p1986_p3 = scmp.ne.s32.totalorder %s27_s22, %s1985_s30  ;;  %p1991_p5 = scmp.lt.s32.totalorder %s1985_s30, %s1985_s30 }
   0xb   :  { %p1992_p6 = por %p1991_p5, %p1990_p4 }
   0xd   :  { %p1993_p7 = pnand %p1992_p6, %p1986_p3 }
   0xf   :  { %1996 = shalt.err (!%p1993_p7)
}
  0x10   :  { %s2024_s7 = smov 64   ;;  %s2025_s8 = smov 4  }
  0x11   :  { %32 = dma.hbm_to_vmem [thread:$0]  %s2614_s4, 1024, %s27_s22, [#allocation4], %s2024_s7, %s2024_s7, %s2025_s8  }
  0x12   :  { %2019 = dma.done.wait [#allocation4], 1024  }
  0x13   :  { %2020 = vsyncadd [#allocation4], 4294966272  ;;  %v2026_v0 = vmov 0   ;;  %v123_v1 = vld [vmem:[%s2613_s3 + $0x80] sm:$0xff]  ;;  %v124_v3 = vld [vmem:[%s2613_s3 + $0x88] sm:$0xff] }
  0x14   :  { %1918 = vset.pattern.permute.xlu1 %v2026_v0  ;;  %1917 = vset.pattern.permute.xlu0 %v2026_v0  ;;  %v107_v2 = vld [vmem:[%s2613_s3] sm:$0xff]  ;;  %v108_v4 = vld [vmem:[%s2613_s3 + $0x8] sm:$0xff]  ;;  %v125_v5 = vld [vmem:[%s2613_s3 + $0x90] sm:$0xff] }
  0x15   :  { %221 = vperm.xlu0 %1917, %v123_v1   ;;  %141 = vperm.xlu1 %1918, %v107_v2   ;;  %v126_v6 = vld [vmem:[%s2613_s3 + $0x98] sm:$0xff]  ;;  %v109_v7 = vld [vmem:[%s2613_s3 + $0x10] sm:$0xff]  ;;  %v127_v9 = vld [vmem:[%s2613_s3 + $0xa0] sm:$0xff] }
  0x16   :  { %v110_v8 = vld [vmem:[%s2613_s3 + $0x18] sm:$0xff]  ;;  %v128_v10 = vld [vmem:[%s2613_s3 + $0xa8] sm:$0xff]  ;;  %v111_v11 = vld [vmem:[%s2613_s3 + $0x20] sm:$0xff] }
  0x17   :  { %v112_v12 = vld [vmem:[%s2613_s3 + $0x28] sm:$0xff]  ;;  %v129_v13 = vld [vmem:[%s2613_s3 + $0xb0] sm:$0xff]  ;;  %v130_v14 = vld [vmem:[%s2613_s3 + $0xb8] sm:$0xff] }
  0x18   :  { %v113_v15 = vld [vmem:[%s2613_s3 + $0x30] sm:$0xff]  ;;  %v114_v16 = vld [vmem:[%s2613_s3 + $0x38] sm:$0xff]  ;;  %v131_v17 = vld [vmem:[%s2613_s3 + $0xc0] sm:$0xff] }
  0x19   :  { %226 = vperm.xlu0 %1917, %v124_v3   ;;  %146 = vperm.xlu1 %1918, %v108_v4   ;;  %v132_v18 = vld [vmem:[%s2613_s3 + $0xc8] sm:$0xff]  ;;  %v115_v19 = vld [vmem:[%s2613_s3 + $0x40] sm:$0xff]  ;;  %v133_v21 = vld [vmem:[%s2613_s3 + $0xd0] sm:$0xff] }
  0x1a   :  { %v116_v20 = vld [vmem:[%s2613_s3 + $0x48] sm:$0xff]  ;;  %v134_v22 = vld [vmem:[%s2613_s3 + $0xd8] sm:$0xff]  ;;  %v117_v23 = vld [vmem:[%s2613_s3 + $0x50] sm:$0xff] }
  0x1b   :  { %v118_v24 = vld [vmem:[%s2613_s3 + $0x58] sm:$0xff]  ;;  %v135_v25 = vld [vmem:[%s2613_s3 + $0xe0] sm:$0xff]  ;;  %v136_v26 = vld [vmem:[%s2613_s3 + $0xe8] sm:$0xff] }
  0x1c   :  { %v119_v27 = vld [vmem:[%s2613_s3 + $0x60] sm:$0xff]  ;;  %v120_v28 = vld [vmem:[%s2613_s3 + $0x68] sm:$0xff]  ;;  %v137_v29 = vld [vmem:[%s2613_s3 + $0xf0] sm:$0xff] }
  0x1d   :  { %231 = vperm.xlu0 %1917, %v125_v5   ;;  %236 = vperm.xlu1 %1918, %v126_v6   ;;  %v138_v30 = vld [vmem:[%s2613_s3 + $0xf8] sm:$0xff]  ;;  %v121_v31 = vld [vmem:[%s2613_s3 + $0x70] sm:$0xff]  ;;  %v831_v33 = vld [vmem:[%s2612_s2] sm:$0xff] }
  0x1e   :  { %v122_v32 = vld [vmem:[%s2613_s3 + $0x78] sm:$0xff]  ;;  %v832_v34 = vld [vmem:[%s2612_s2 + $0x8] sm:$0xff]  ;;  %v833_v36 = vld [vmem:[%s2612_s2 + $0x10] sm:$0xff] }
  0x1f   :  { %v1921_v35 = vld [vmem:[%s2610_s0 + $0x4] ss:$8 sps:$4 sm:$0xff]   ;;  %v834_v37 = vld [vmem:[%s2612_s2 + $0x18] sm:$0xff]  ;;  %v837_v41 = vld [vmem:[%s2612_s2 + $0x30] sm:$0xff] }
  0x20   :  { %v1924_v38 = vld [vmem:[%s2610_s0 + $0xc4] ss:$8 sps:$4 sm:$0xff]   ;;  %603 = vmatprep.mubr.bf16.mxu0 %v1921_v35  ;;  %v838_v42 = vld [vmem:[%s2612_s2 + $0x38] sm:$0xff]  ;;  %v841_v45 = vld [vmem:[%s2612_s2 + $0x50] sm:$0xff] }
  0x21   :  { %151 = vperm.xlu0 %1917, %v109_v7   ;;  %156 = vperm.xlu1 %1918, %v110_v8   ;;  %v835_v39 = vld [vmem:[%s2612_s2 + $0x20] sm:$0xff]  ;;  %v836_v40 = vld [vmem:[%s2612_s2 + $0x28] sm:$0xff]  ;;  %v842_v46 = vld [vmem:[%s2612_s2 + $0x58] sm:$0xff] }
  0x22   :  { %699 = vmatprep.mubr.bf16.mxu1 %v1924_v38  ;;  %v839_v43 = vld [vmem:[%s2612_s2 + $0x40] sm:$0xff]  ;;  %v840_v44 = vld [vmem:[%s2612_s2 + $0x48] sm:$0xff]  ;;  %v845_v49 = vld [vmem:[%s2612_s2 + $0x70] sm:$0xff] }
  0x23   :  { %v843_v47 = vld [vmem:[%s2612_s2 + $0x60] sm:$0xff]  ;;  %v844_v48 = vld [vmem:[%s2612_s2 + $0x68] sm:$0xff]  ;;  %v846_v50 = vld [vmem:[%s2612_s2 + $0x78] sm:$0xff] }
  0x24   :  { %v847_v51 = vld [vmem:[%s2612_s2 + $0x80] sm:$0xff]  ;;  %v848_v52 = vld [vmem:[%s2612_s2 + $0x88] sm:$0xff]  ;;  %v849_v53 = vld [vmem:[%s2612_s2 + $0x90] sm:$0xff] }
  0x25   :  { %241 = vperm.xlu0 %1917, %v127_v9   ;;  %246 = vperm.xlu1 %1918, %v128_v10   ;;  %v850_v54 = vld [vmem:[%s2612_s2 + $0x98] sm:$0xff]  ;;  %v851_v55 = vld [vmem:[%s2612_s2 + $0xa0] sm:$0xff]  ;;  %v852_v56 = vld [vmem:[%s2612_s2 + $0xa8] sm:$0xff] }
  0x26   :  { %v853_v57 = vld [vmem:[%s2612_s2 + $0xb0] sm:$0xff]  ;;  %v854_v58 = vld [vmem:[%s2612_s2 + $0xb8] sm:$0xff]  ;;  %v855_v59 = vld [vmem:[%s2612_s2 + $0xc0] sm:$0xff] }
  0x27   :  { %v856_v60 = vld [vmem:[%s2612_s2 + $0xc8] sm:$0xff]  ;;  %v857_v61 = vld [vmem:[%s2612_s2 + $0xd0] sm:$0xff]  ;;  %v858_v62 = vld [vmem:[%s2612_s2 + $0xd8] sm:$0xff] }
  0x28   :  { %v859_v63 = vld [vmem:[%s2612_s2 + $0xe0] sm:$0xff]  ;;  %v860_v0 = vld [vmem:[%s2612_s2 + $0xe8] sm:$0xff]  ;;  %v861_v1 = vld [vmem:[%s2612_s2 + $0xf0] sm:$0xff] }
  0x29   :  { %161 = vperm.xlu0 %1917, %v111_v11   ;;  %166 = vperm.xlu1 %1918, %v112_v12   ;;  %v862_v2 = vld [vmem:[%s2612_s2 + $0xf8] sm:$0xff]  ;;  %v91_v5 = vld [vmem:[%s2611_s1 + $0x80] sm:$0xff]  ;;  %v92_v7 = vld [vmem:[%s2611_s1 + $0x88] sm:$0xff] }
  0x2a   :  { %v75_v6 = vld [vmem:[%s2611_s1] sm:$0xff]  ;;  %v76_v8 = vld [vmem:[%s2611_s1 + $0x8] sm:$0xff] }
  0x2b   :  { %v80_v38 = vld [vmem:[%s2611_s1 + $0x28] sm:$0xff] }
  0x2d   :  { %251 = vperm.xlu0 %1917, %v129_v13   ;;  %256 = vperm.xlu1 %1918, %v130_v14  }
  0x31   :  { %171 = vperm.xlu0 %1917, %v113_v15   ;;  %176 = vperm.xlu1 %1918, %v114_v16   ;;  %v93_v15 = vld [vmem:[%s2611_s1 + $0x90] sm:$0xff]  ;;  %v94_v16 = vld [vmem:[%s2611_s1 + $0x98] sm:$0xff] }
  0x35   :  { %261 = vperm.xlu0 %1917, %v131_v17   ;;  %266 = vperm.xlu1 %1918, %v132_v18  }
  0x39   :  { %181 = vperm.xlu0 %1917, %v115_v19   ;;  %186 = vperm.xlu1 %1918, %v116_v20  }
  0x3d   :  { %271 = vperm.xlu0 %1917, %v133_v21   ;;  %276 = vperm.xlu1 %1918, %v134_v22  }
  0x41   :  { %191 = vperm.xlu0 %1917, %v117_v23   ;;  %196 = vperm.xlu1 %1918, %v118_v24   ;;  %v77_v23 = vld [vmem:[%s2611_s1 + $0x10] sm:$0xff]  ;;  %v78_v24 = vld [vmem:[%s2611_s1 + $0x18] sm:$0xff] }
  0x45   :  { %281 = vperm.xlu0 %1917, %v135_v25   ;;  %286 = vperm.xlu1 %1918, %v136_v26  }
  0x49   :  { %201 = vperm.xlu0 %1917, %v119_v27   ;;  %206 = vperm.xlu1 %1918, %v120_v28  }
  0x4d   :  { %291 = vperm.xlu0 %1917, %v137_v29   ;;  %296 = vperm.xlu1 %1918, %v138_v30   ;;  %v95_v30 = vld [vmem:[%s2611_s1 + $0xa0] sm:$0xff] }
  0x51   :  { %211 = vperm.xlu0 %1917, %v121_v31   ;;  %216 = vperm.xlu1 %1918, %v122_v32   ;;  %v96_v31 = vld [vmem:[%s2611_s1 + $0xa8] sm:$0xff] }
  0x55   :  { %865 = vperm.xlu0 %1917, %v831_v33   ;;  %870 = vperm.xlu1 %1918, %v832_v34  }
  0x59   :  { %875 = vperm.xlu0 %1917, %v833_v36   ;;  %880 = vperm.xlu1 %1918, %v834_v37   ;;  %v79_v37 = vld [vmem:[%s2611_s1 + $0x20] sm:$0xff] }
  0x5d   :  { %885 = vperm.xlu0 %1917, %v835_v39   ;;  %890 = vperm.xlu1 %1918, %v836_v40  }
  0x61   :  { %895 = vperm.xlu0 %1917, %v837_v41   ;;  %900 = vperm.xlu1 %1918, %v838_v42  }
  0x65   :  { %905 = vperm.xlu0 %1917, %v839_v43   ;;  %910 = vperm.xlu1 %1918, %v840_v44   ;;  %v97_v44 = vld [vmem:[%s2611_s1 + $0xb0] sm:$0xff] }
  0x69   :  { %915 = vperm.xlu0 %1917, %v841_v45   ;;  %920 = vperm.xlu1 %1918, %v842_v46   ;;  %v98_v45 = vld [vmem:[%s2611_s1 + $0xb8] sm:$0xff] }
  0x6d   :  { %925 = vperm.xlu0 %1917, %v843_v47   ;;  %930 = vperm.xlu1 %1918, %v844_v48  }
  0x71   :  { %935 = vperm.xlu0 %1917, %v845_v49   ;;  %940 = vperm.xlu1 %1918, %v846_v50  }
  0x75   :  { %945 = vperm.xlu0 %1917, %v847_v51   ;;  %950 = vperm.xlu1 %1918, %v848_v52   ;;  %v81_v51 = vld [vmem:[%s2611_s1 + $0x30] sm:$0xff]  ;;  %v82_v52 = vld [vmem:[%s2611_s1 + $0x38] sm:$0xff] }
  0x79   :  { %955 = vperm.xlu0 %1917, %v849_v53   ;;  %960 = vperm.xlu1 %1918, %v850_v54  }
  0x7d   :  { %965 = vperm.xlu0 %1917, %v851_v55   ;;  %970 = vperm.xlu1 %1918, %v852_v56  }
  0x81   :  { %975 = vperm.xlu0 %1917, %v853_v57   ;;  %980 = vperm.xlu1 %1918, %v854_v58   ;;  %v99_v58 = vld [vmem:[%s2611_s1 + $0xc0] sm:$0xff] }
  0x85   :  { %985 = vperm.xlu0 %1917, %v855_v59   ;;  %990 = vperm.xlu1 %1918, %v856_v60   ;;  %v100_v59 = vld [vmem:[%s2611_s1 + $0xc8] sm:$0xff] }
  0x89   :  { %995 = vperm.xlu0 %1917, %v857_v61   ;;  %1000 = vperm.xlu1 %1918, %v858_v62  }
  0x8d   :  { %1005 = vperm.xlu0 %1917, %v859_v63   ;;  %1010 = vperm.xlu1 %1918, %v860_v0  }
  0x91   :  { %1015 = vperm.xlu0 %1917, %v861_v1   ;;  %1020 = vperm.xlu1 %1918, %v862_v2   ;;  %v83_v1 = vld [vmem:[%s2611_s1 + $0x40] sm:$0xff]  ;;  %v84_v2 = vld [vmem:[%s2611_s1 + $0x48] sm:$0xff] }
  0x94   :  { %v222_v3 = vpop.permute.xlu0 %221  ;;  %v142_v4 = vpop.permute.xlu1 %141 }
  0x95   :  { %v315_v11 = vmul.f32 %v222_v3, %v91_v5  ;;  %v299_v12 = vmul.f32 %v142_v4, %v75_v6 }
  0x98   :  { %v227_v9 = vpop.permute.xlu0 %226  ;;  %v147_v10 = vpop.permute.xlu1 %146 }
  0x99   :  { %v316_v13 = vmul.f32 %v227_v9, %v92_v7  ;;  %v300_v14 = vmul.f32 %v147_v10, %v76_v8  ;;  %v101_v8 = vld [vmem:[%s2611_s1 + $0xd0] sm:$0xff]  ;;  %v102_v9 = vld [vmem:[%s2611_s1 + $0xd8] sm:$0xff] }
  0x9b   :  { %v403_v17 = vpack.c.bf16 %v316_v13, %v315_v11  ;;  %v395_v18 = vpack.c.bf16 %v300_v14, %v299_v12 }
  0x9c   :  { %v232_v19 = vpop.permute.xlu0 %231  ;;  %v237_v20 = vpop.permute.xlu1 %236 }
  0x9d   :  { %v317_v21 = vmul.f32 %v232_v19, %v93_v15  ;;  %v318_v22 = vmul.f32 %v237_v20, %v94_v16  ;;  %1712 = vmatprep.subr.bf16.mxu0 %v403_v17  ;;  %1896 = vmatprep.subr.bf16.mxu1 %v403_v17  ;;  %v85_v15 = vld [vmem:[%s2611_s1 + $0x50] sm:$0xff]  ;;  %v86_v16 = vld [vmem:[%s2611_s1 + $0x58] sm:$0xff] }
  0x9e   :  { %1713 = vmatpush3.bf16.msra.mxu0 %v395_v18  ;;  %1904 = vmatpush3.bf16.msra.mxu1 %v395_v18 }
  0x9f   :  { %v404_v25 = vpack.c.bf16 %v318_v22, %v317_v21  ;;  %v103_v22 = vld [vmem:[%s2611_s1 + $0xe0] sm:$0xff] }
  0xa0   :  { %v152_v26 = vpop.permute.xlu0 %151  ;;  %v157_v27 = vpop.permute.xlu1 %156 }
  0xa1   :  { %v301_v28 = vmul.f32 %v152_v26, %v77_v23  ;;  %v302_v29 = vmul.f32 %v157_v27, %v78_v24  ;;  %1714 = vmatprep.subr.bf16.mxu0 %v404_v25  ;;  %1897 = vmatprep.subr.bf16.mxu1 %v404_v25  ;;  %v104_v23 = vld [vmem:[%s2611_s1 + $0xe8] sm:$0xff] }
  0xa3   :  { %v396_v32 = vpack.c.bf16 %v302_v29, %v301_v28  ;;  %v87_v29 = vld [vmem:[%s2611_s1 + $0x60] sm:$0xff] }
  0xa4   :  { %v242_v33 = vpop.permute.xlu0 %241  ;;  %v247_v34 = vpop.permute.xlu1 %246 }
  0xa5   :  { %v319_v35 = vmul.f32 %v242_v33, %v95_v30  ;;  %v320_v36 = vmul.f32 %v247_v34, %v96_v31  ;;  %1715 = vmatpush3.bf16.msra.mxu0 %v396_v32  ;;  %1905 = vmatpush3.bf16.msra.mxu1 %v396_v32  ;;  %v88_v30 = vld [vmem:[%s2611_s1 + $0x68] sm:$0xff] }
  0xa7   :  { %v405_v39 = vpack.c.bf16 %v320_v36, %v319_v35  ;;  %v105_v36 = vld [vmem:[%s2611_s1 + $0xf0] sm:$0xff] }
  0xa8   :  { %v162_v40 = vpop.permute.xlu0 %161  ;;  %v167_v41 = vpop.permute.xlu1 %166 }
  0xa9   :  { %v303_v42 = vmul.f32 %v162_v40, %v79_v37  ;;  %v304_v43 = vmul.f32 %v167_v41, %v80_v38  ;;  %1716 = vmatprep.subr.bf16.mxu0 %v405_v39  ;;  %1898 = vmatprep.subr.bf16.mxu1 %v405_v39  ;;  %v106_v37 = vld [vmem:[%s2611_s1 + $0xf8] sm:$0xff] }
  0xab   :  { %v397_v46 = vpack.c.bf16 %v304_v43, %v303_v42  ;;  %v89_v43 = vld [vmem:[%s2611_s1 + $0x70] sm:$0xff] }
  0xac   :  { %v252_v47 = vpop.permute.xlu0 %251  ;;  %v257_v48 = vpop.permute.xlu1 %256 }
  0xad   :  { %v321_v49 = vmul.f32 %v252_v47, %v97_v44  ;;  %v322_v50 = vmul.f32 %v257_v48, %v98_v45  ;;  %1717 = vmatpush3.bf16.msra.mxu0 %v397_v46  ;;  %1906 = vmatpush3.bf16.msra.mxu1 %v397_v46  ;;  %v90_v44 = vld [vmem:[%s2611_s1 + $0x78] sm:$0xff] }
  0xaf   :  { %v406_v53 = vpack.c.bf16 %v322_v50, %v321_v49  ;;  %v1967_v50 = vld [vmem:[#allocation3] sm:$0xff]  }
  0xb0   :  { %v172_v54 = vpop.permute.xlu0 %171  ;;  %v177_v55 = vpop.permute.xlu1 %176 }
  0xb1   :  { %v305_v56 = vmul.f32 %v172_v54, %v81_v51  ;;  %v306_v57 = vmul.f32 %v177_v55, %v82_v52  ;;  %1718 = vmatprep.subr.bf16.mxu0 %v406_v53  ;;  %1899 = vmatprep.subr.bf16.mxu1 %v406_v53  ;;  %v1919_v52 = vld [vmem:[%s2610_s0] ss:$8 sps:$4 sm:$0xff]   ;;  %v1925_v54 = vld [vmem:[%s2610_s0 + $0x14] ss:$8 sps:$4 sm:$0xff]  }
  0xb2   :  { %v1922_v53 = vld [vmem:[%s2610_s0 + $0xc0] ss:$8 sps:$4 sm:$0xff]   ;;  %v1927_v55 = vld [vmem:[%s2610_s0 + $0xd4] ss:$8 sps:$4 sm:$0xff]  }
  0xb3   :  { %v398_v60 = vpack.c.bf16 %v306_v57, %v305_v56  ;;  %v1968_v56 = vld [vmem:[#allocation3 + $0x8] sm:$0xff]   ;;  %v1969_v57 = vld [vmem:[#allocation3 + $0x10] sm:$0xff]  }
  0xb4   :  { %v262_v61 = vpop.permute.xlu0 %261  ;;  %v267_v62 = vpop.permute.xlu1 %266 }
  0xb5   :  { %v323_v63 = vmul.f32 %v262_v61, %v99_v58  ;;  %v324_v0 = vmul.f32 %v267_v62, %v100_v59  ;;  %1719 = vmatpush3.bf16.msra.mxu0 %v398_v60  ;;  %1907 = vmatpush3.bf16.msra.mxu1 %v398_v60  ;;  %v1929_v58 = vld [vmem:[%s2610_s0 + $0x10] ss:$8 sps:$4 sm:$0xff]   ;;  %v1931_v60 = vld [vmem:[%s2610_s0 + $0x24] ss:$8 sps:$4 sm:$0xff]  }
  0xb6   :  { %v1930_v59 = vld [vmem:[%s2610_s0 + $0xd0] ss:$8 sps:$4 sm:$0xff]   ;;  %v1933_v61 = vld [vmem:[%s2610_s0 + $0xe4] ss:$8 sps:$4 sm:$0xff]  }
  0xb7   :  { %v407_v3 = vpack.c.bf16 %v324_v0, %v323_v63  ;;  %v1970_v62 = vld [vmem:[#allocation3 + $0x18] sm:$0xff]   ;;  %v1935_v63 = vld [vmem:[%s2610_s0 + $0x20] ss:$8 sps:$4 sm:$0xff]  }
  0xb8   :  { %v182_v4 = vpop.permute.xlu0 %181  ;;  %v187_v5 = vpop.permute.xlu1 %186  ;;  %v1936_v0 = vld [vmem:[%s2610_s0 + $0xe0] ss:$8 sps:$4 sm:$0xff]  }
  0xb9   :  { %v307_v6 = vmul.f32 %v182_v4, %v83_v1  ;;  %v308_v7 = vmul.f32 %v187_v5, %v84_v2  ;;  %1720 = vmatprep.subr.bf16.mxu0 %v407_v3  ;;  %1900 = vmatprep.subr.bf16.mxu1 %v407_v3  ;;  %v1937_v1 = vld [vmem:[%s2610_s0 + $0x34] ss:$8 sps:$4 sm:$0xff]   ;;  %v1941_v3 = vld [vmem:[%s2610_s0 + $0x30] ss:$8 sps:$4 sm:$0xff]   ;;  %v1943_v5 = vld [vmem:[%s2610_s0 + $0x44] ss:$8 sps:$4 sm:$0xff]  }
  0xba   :  { %v1939_v2 = vld [vmem:[%s2610_s0 + $0xf4] ss:$8 sps:$4 sm:$0xff]   ;;  %v1942_v4 = vld [vmem:[%s2610_s0 + $0xf0] ss:$8 sps:$4 sm:$0xff]  }
  0xbb   :  { %v399_v10 = vpack.c.bf16 %v308_v7, %v307_v6  ;;  %v1945_v6 = vld [vmem:[%s2610_s0 + $0x40] ss:$8 sps:$4 sm:$0xff]   ;;  %v1946_v7 = vld [vmem:[%s2610_s0 + $0x54] ss:$8 sps:$4 sm:$0xff]  }
  0xbc   :  { %v272_v11 = vpop.permute.xlu0 %271  ;;  %v277_v12 = vpop.permute.xlu1 %276 }
  0xbd   :  { %v325_v13 = vmul.f32 %v272_v11, %v101_v8  ;;  %v326_v14 = vmul.f32 %v277_v12, %v102_v9  ;;  %1721 = vmatpush3.bf16.msra.mxu0 %v399_v10  ;;  %1908 = vmatpush3.bf16.msra.mxu1 %v399_v10  ;;  %v1948_v8 = vld [vmem:[%s2610_s0 + $0x50] ss:$8 sps:$4 sm:$0xff]   ;;  %v1949_v9 = vld [vmem:[%s2610_s0 + $0x64] ss:$8 sps:$4 sm:$0xff]   ;;  %v1951_v10 = vld [vmem:[%s2610_s0 + $0x60] ss:$8 sps:$4 sm:$0xff]  }
  0xbe   :  { %v1952_v11 = vld [vmem:[%s2610_s0 + $0x74] ss:$8 sps:$4 sm:$0xff]   ;;  %v1954_v12 = vld [vmem:[%s2610_s0 + $0x70] ss:$8 sps:$4 sm:$0xff]  }
  0xbf   :  { %v408_v17 = vpack.c.bf16 %v326_v14, %v325_v13  ;;  %v1955_v13 = vld [vmem:[%s2610_s0 + $0x84] ss:$8 sps:$4 sm:$0xff]   ;;  %v1957_v14 = vld [vmem:[%s2610_s0 + $0x80] ss:$8 sps:$4 sm:$0xff]  }
  0xc0   :  { %v192_v18 = vpop.permute.xlu0 %191  ;;  %v197_v19 = vpop.permute.xlu1 %196 }
  0xc1   :  { %v309_v20 = vmul.f32 %v192_v18, %v85_v15  ;;  %v310_v21 = vmul.f32 %v197_v19, %v86_v16  ;;  %1722 = vmatprep.subr.bf16.mxu0 %v408_v17  ;;  %1901 = vmatprep.subr.bf16.mxu1 %v408_v17  ;;  %v1958_v15 = vld [vmem:[%s2610_s0 + $0x94] ss:$8 sps:$4 sm:$0xff]   ;;  %v1960_v16 = vld [vmem:[%s2610_s0 + $0x90] ss:$8 sps:$4 sm:$0xff]   ;;  %v1961_v17 = vld [vmem:[%s2610_s0 + $0xa4] ss:$8 sps:$4 sm:$0xff]  }
  0xc2   :  { %v1963_v18 = vld [vmem:[%s2610_s0 + $0xa0] ss:$8 sps:$4 sm:$0xff]   ;;  %v1964_v19 = vld [vmem:[%s2610_s0 + $0xb4] ss:$8 sps:$4 sm:$0xff]  }
  0xc3   :  { %v400_v24 = vpack.c.bf16 %v310_v21, %v309_v20  ;;  %v1971_v20 = vld [vmem:[#allocation3 + $0x20] sm:$0xff]   ;;  %v1966_v21 = vld [vmem:[%s2610_s0 + $0xb0] ss:$8 sps:$4 sm:$0xff]  }
  0xc4   :  { %v282_v25 = vpop.permute.xlu0 %281  ;;  %v287_v26 = vpop.permute.xlu1 %286 }
  0xc5   :  { %v327_v27 = vmul.f32 %v282_v25, %v103_v22  ;;  %v328_v28 = vmul.f32 %v287_v26, %v104_v23  ;;  %1723 = vmatpush3.bf16.msra.mxu0 %v400_v24  ;;  %1909 = vmatpush3.bf16.msra.mxu1 %v400_v24  ;;  %v1972_v22 = vld [vmem:[#allocation3 + $0x28] sm:$0xff]   ;;  %v1973_v23 = vld [vmem:[#allocation3 + $0x30] sm:$0xff]   ;;  %v1974_v24 = vld [vmem:[#allocation3 + $0x38] sm:$0xff]  }
  0xc7   :  { %v409_v31 = vpack.c.bf16 %v328_v28, %v327_v27 }
  0xc8   :  { %v202_v32 = vpop.permute.xlu0 %201  ;;  %v207_v33 = vpop.permute.xlu1 %206 }
  0xc9   :  { %v311_v34 = vmul.f32 %v202_v32, %v87_v29  ;;  %v312_v35 = vmul.f32 %v207_v33, %v88_v30  ;;  %1724 = vmatprep.subr.bf16.mxu0 %v409_v31  ;;  %1902 = vmatprep.subr.bf16.mxu1 %v409_v31 }
  0xcb   :  { %v401_v38 = vpack.c.bf16 %v312_v35, %v311_v34 }
  0xcc   :  { %v292_v39 = vpop.permute.xlu0 %291  ;;  %v297_v40 = vpop.permute.xlu1 %296 }
  0xcd   :  { %v329_v41 = vmul.f32 %v292_v39, %v105_v36  ;;  %v330_v42 = vmul.f32 %v297_v40, %v106_v37  ;;  %1725 = vmatpush3.bf16.msra.mxu0 %v401_v38  ;;  %1910 = vmatpush3.bf16.msra.mxu1 %v401_v38 }
  0xcf   :  { %v410_v45 = vpack.c.bf16 %v330_v42, %v329_v41 }
  0xd0   :  { %v212_v46 = vpop.permute.xlu0 %211  ;;  %v217_v47 = vpop.permute.xlu1 %216 }
  0xd1   :  { %v313_v48 = vmul.f32 %v212_v46, %v89_v43  ;;  %v314_v49 = vmul.f32 %v217_v47, %v90_v44  ;;  %1726 = vmatprep.subr.bf16.mxu0 %v410_v45  ;;  %1903 = vmatprep.subr.bf16.mxu1 %v410_v45 }
  0xd3   :  { %v402_v51 = vpack.c.bf16 %v314_v49, %v313_v48 }
  0xd4   :  { %v866_v25 = vpop.permute.xlu0 %865  ;;  %v871_v26 = vpop.permute.xlu1 %870 }
  0xd5   :  { %1727 = vmatpush3.bf16.msra.mxu0 %v402_v51  ;;  %1911 = vmatpush3.bf16.msra.mxu1 %v402_v51 }
  0xd6   :  { %1848 = vmatprep.subr.bf16.mxu1 %v1967_v50 }
  0xd8   :  { %604 = vmatmul.mubr.bf16.vlgmr.msra.gmra.mrb[0].mxu0 %v1919_v52  ;;  %700 = vmatmul.mubr.bf16.vlgmr.msra.gmra.mrb[0].mxu1 %v1922_v53  ;;  %v876_v27 = vpop.permute.xlu0 %875  ;;  %v881_v28 = vpop.permute.xlu1 %880 }
  0xd9   :  { %611 = vmatprep.mubr.bf16.mxu0 %v1925_v54  ;;  %707 = vmatprep.mubr.bf16.mxu1 %v1927_v55 }
  0xda   :  { %1849 = vmatpush3.bf16.msra.mxu1 %v1967_v50 }
  0xdb   :  { %1850 = vmatprep.subr.bf16.mxu1 %v1968_v56 }
  0xdc   :  { %v2462_v29 = vpop.permute.xlu0 %885  ;;  %v2464_v30 = vpop.permute.xlu1 %890 }
  0xde   :  { %1851 = vmatpush3.bf16.msra.mxu1 %v1968_v56 }
  0xdf   :  { %1852 = vmatprep.subr.bf16.mxu1 %v1969_v57 }
  0xe0   :  { %612 = vmatmul.mubr.bf16.gmra.mrb[4].mxu0 %v1929_v58  ;;  %708 = vmatmul.mubr.bf16.gmra.mrb[4].mxu1 %v1930_v59  ;;  %v2466_v31 = vpop.permute.xlu0 %895  ;;  %v2468_v32 = vpop.permute.xlu1 %900 }
  0xe1   :  { %619 = vmatprep.mubr.bf16.mxu0 %v1931_v60  ;;  %715 = vmatprep.mubr.bf16.mxu1 %v1933_v61 }
  0xe2   :  { %1853 = vmatpush3.bf16.msra.mxu1 %v1969_v57 }
  0xe3   :  { %1854 = vmatprep.subr.bf16.mxu1 %v1970_v62 }
  0xe4   :  { %v2470_v33 = vpop.permute.xlu0 %905  ;;  %v2472_v34 = vpop.permute.xlu1 %910 }
  0xe6   :  { %1855 = vmatpush3.bf16.msra.mxu1 %v1970_v62 }
  0xe7   :  { %1856 = vmatprep.subr.bf16.mxu1 %v1971_v20 }
  0xe8   :  { %620 = vmatmul.mubr.bf16.gmra.mrb[8].mxu0 %v1935_v63  ;;  %716 = vmatmul.mubr.bf16.gmra.mrb[8].mxu1 %v1936_v0  ;;  %v2474_v35 = vpop.permute.xlu0 %915  ;;  %v2476_v36 = vpop.permute.xlu1 %920 }
  0xe9   :  { %627 = vmatprep.mubr.bf16.mxu0 %v1937_v1  ;;  %723 = vmatprep.mubr.bf16.mxu1 %v1939_v2 }
  0xea   :  { %1857 = vmatpush3.bf16.msra.mxu1 %v1971_v20 }
  0xeb   :  { %1858 = vmatprep.subr.bf16.mxu1 %v1972_v22 }
  0xec   :  { %v2478_v37 = vpop.permute.xlu0 %925  ;;  %v2480_v38 = vpop.permute.xlu1 %930 }
  0xee   :  { %1859 = vmatpush3.bf16.msra.mxu1 %v1972_v22 }
  0xef   :  { %1860 = vmatprep.subr.bf16.mxu1 %v1973_v23 }
  0xf0   :  { %628 = vmatmul.mubr.bf16.gmra.mrb[12].mxu0 %v1941_v3  ;;  %724 = vmatmul.mubr.bf16.gmra.mrb[12].mxu1 %v1942_v4  ;;  %v2482_v39 = vpop.permute.xlu0 %935  ;;  %v2484_v40 = vpop.permute.xlu1 %940 }
  0xf1   :  { %635 = vmatprep.mubr.bf16.mxu0 %v1943_v5 }
  0xf2   :  { %1861 = vmatpush3.bf16.msra.mxu1 %v1973_v23 }
  0xf3   :  { %1862 = vmatprep.subr.bf16.mxu1 %v1974_v24 }
  0xf4   :  { %v2486_v41 = vpop.permute.xlu0 %945  ;;  %v2488_v42 = vpop.permute.xlu1 %950 }
  0xf6   :  { %1863 = vmatpush3.bf16.msra.mxu1 %v1974_v24 }
  0xf8   :  { %636 = vmatmul.mubr.bf16.gmra.mrb[16].mxu0 %v1945_v6  ;;  %v2490_v43 = vpop.permute.xlu0 %955  ;;  %v2492_v44 = vpop.permute.xlu1 %960 }
  0xf9   :  { %643 = vmatprep.mubr.bf16.mxu0 %v1946_v7 }
  0xfc   :  { %v2494_v45 = vpop.permute.xlu0 %965  ;;  %v2496_v46 = vpop.permute.xlu1 %970 }
 0x100   :  { %644 = vmatmul.mubr.bf16.gmra.mrb[20].mxu0 %v1948_v8  ;;  %v2498_v47 = vpop.permute.xlu0 %975  ;;  %v2500_v48 = vpop.permute.xlu1 %980 }
 0x101   :  { %651 = vmatprep.mubr.bf16.mxu0 %v1949_v9 }
 0x104   :  { %v986_v61 = vpop.permute.xlu0 %985  ;;  %v991_v62 = vpop.permute.xlu1 %990 }
 0x108   :  { %652 = vmatmul.mubr.bf16.gmra.mrb[24].mxu0 %v1951_v10 }
 0x109   :  { %659 = vmatprep.mubr.bf16.mxu0 %v1952_v11 }
 0x110   :  { %660 = vmatmul.mubr.bf16.gmra.mrb[28].mxu0 %v1954_v12 }
 0x111   :  { %667 = vmatprep.mubr.bf16.mxu0 %v1955_v13 }
 0x118   :  { %668 = vmatmul.mubr.bf16.gmra.mrb[32].mxu0 %v1957_v14 }
 0x119   :  { %675 = vmatprep.mubr.bf16.mxu0 %v1958_v15 }
 0x120   :  { %676 = vmatmul.mubr.bf16.gmra.mrb[36].mxu0 %v1960_v16 }
 0x121   :  { %683 = vmatprep.mubr.bf16.mxu0 %v1961_v17  ;;  %v996_v17 = vpop.permute.xlu0 %995 }
 0x128   :  { %684 = vmatmul.mubr.bf16.gmra.mrb[40].mxu0 %v1963_v18  ;;  %v1001_v18 = vpop.permute.xlu1 %1000 }
 0x129   :  { %691 = vmatprep.mubr.bf16.mxu0 %v1964_v19 }
 0x130   :  { %692 = vmatmul.mubr.bf16.gmra.mrb[44].mxu0 %v1966_v21 }
 0x1ab   :  { %v1728_v49 = vpop.f32.mrb[0].mxu0  ;;  %v1800_v50 = vpop.f32.mrb[0].mxu1 }
 0x1ac   :  { %v1729_v51 = vpop.f32.mrb[1].mxu0  ;;  %v1801_v52 = vpop.f32.mrb[1].mxu1 }
 0x1ad   :  { %v1730_v53 = vadd.f32 %v1729_v51, %v1728_v49  ;;  %v1802_v54 = vadd.f32 %v1801_v52, %v1800_v50  ;;  %v1731_v55 = vpop.f32.mrb[2].mxu0  ;;  %v1803_v56 = vpop.f32.mrb[2].mxu1 }
 0x1ae   :  { %v1732_v57 = vpop.f32.mrb[3].mxu0  ;;  %v1804_v58 = vpop.f32.mrb[3].mxu1 }
 0x1af   :  { %v1733_v59 = vadd.f32 %v1732_v57, %v1731_v55  ;;  %v1805_v60 = vadd.f32 %v1804_v58, %v1803_v56  ;;  %v1023_v63 = vmul.f32 %v1730_v53, %v866_v25  ;;  %v2502_v0 = vmul.f32 %v1802_v54, %v986_v61  ;;  %v1011_v58 = vpop.permute.xlu1 %1010 }
 0x1b1   :  { %v1024_v1 = vmul.f32 %v1733_v59, %v871_v26  ;;  %v2504_v2 = vmul.f32 %v1805_v60, %v991_v62 }
 0x1b3   :  { %v1734_v3 = vpop.f32.mrb[4].mxu0  ;;  %v1806_v4 = vpop.f32.mrb[4].mxu1  ;;  %v1055_v5 = vpack.c.bf16 %v1024_v1, %v1023_v63  ;;  %v1067_v6 = vpack.c.bf16 %v2504_v2, %v2502_v0 }
 0x1b4   :  { %v1735_v7 = vpop.f32.mrb[5].mxu0  ;;  %v1807_v8 = vpop.f32.mrb[5].mxu1 }
 0x1b5   :  { %v1736_v9 = vadd.f32 %v1735_v7, %v1734_v3  ;;  %v1808_v10 = vadd.f32 %v1807_v8, %v1806_v4  ;;  %v1737_v11 = vpop.f32.mrb[6].mxu0  ;;  %v1809_v12 = vpop.f32.mrb[6].mxu1  ;;  %1864 = vmatprep.mubr.bf16.mxu1 %v1055_v5 }
 0x1b6   :  { %v1738_v13 = vpop.f32.mrb[7].mxu0  ;;  %v1810_v14 = vpop.f32.mrb[7].mxu1 }
 0x1b7   :  { %v1739_v15 = vadd.f32 %v1738_v13, %v1737_v11  ;;  %v1811_v16 = vadd.f32 %v1810_v14, %v1809_v12  ;;  %v1025_v19 = vmul.f32 %v1736_v9, %v876_v27  ;;  %v2508_v20 = vmul.f32 %v1808_v10, %v996_v17 }
 0x1b9   :  { %v1026_v21 = vmul.f32 %v1739_v15, %v881_v28  ;;  %v2510_v22 = vmul.f32 %v1811_v16, %v1001_v18  ;;  %v1006_v28 = vpop.permute.xlu0 %1005  ;;  %v1021_v15 = vpop.permute.xlu1 %1020 }
 0x1bb   :  { %v1056_v23 = vpack.c.bf16 %v1026_v21, %v1025_v19  ;;  %v1740_v24 = vpop.f32.mrb[8].mxu0  ;;  %v1812_v25 = vpop.f32.mrb[8].mxu1  ;;  %v1068_v26 = vpack.c.bf16 %v2510_v22, %v2508_v20 }
 0x1bc   :  { %v1741_v49 = vpop.f32.mrb[9].mxu0  ;;  %v1813_v50 = vpop.f32.mrb[9].mxu1 }
 0x1bd   :  { %v1742_v51 = vadd.f32 %v1741_v49, %v1740_v24  ;;  %v1814_v52 = vadd.f32 %v1813_v50, %v1812_v25  ;;  %v1743_v53 = vpop.f32.mrb[10].mxu0  ;;  %v1815_v54 = vpop.f32.mrb[10].mxu1  ;;  %1865 = vmatmul.mubr.bf16.vlgmr.msra.gmra.mrb[16].mxu1 %v1056_v23 }
 0x1be   :  { %v1744_v55 = vpop.f32.mrb[11].mxu0  ;;  %v1816_v27 = vpop.f32.mrb[11].mxu1 }
 0x1bf   :  { %v1745_v56 = vadd.f32 %v1744_v55, %v1743_v53  ;;  %v1817_v57 = vadd.f32 %v1816_v27, %v1815_v54  ;;  %v1027_v59 = vmul.f32 %v1742_v51, %v2462_v29  ;;  %v2515_v60 = vmul.f32 %v1814_v52, %v1006_v28 }
 0x1c1   :  { %v1028_v61 = vmul.f32 %v1745_v56, %v2464_v30  ;;  %v2518_v62 = vmul.f32 %v1817_v57, %v1011_v58  ;;  %v1016_v30 = vpop.permute.xlu0 %1015 }
 0x1c3   :  { %v1746_v63 = vpop.f32.mrb[12].mxu0  ;;  %v1818_v1 = vpop.f32.mrb[12].mxu1  ;;  %v1057_v3 = vpack.c.bf16 %v1028_v61, %v1027_v59  ;;  %v1069_v4 = vpack.c.bf16 %v2518_v62, %v2515_v60 }
 0x1c4   :  { %v1747_v5 = vpop.f32.mrb[13].mxu0  ;;  %v1819_v7 = vpop.f32.mrb[13].mxu1 }
 0x1c5   :  { %v1748_v8 = vadd.f32 %v1747_v5, %v1746_v63  ;;  %v1820_v9 = vadd.f32 %v1819_v7, %v1818_v1  ;;  %v1749_v10 = vpop.f32.mrb[14].mxu0  ;;  %v1821_v11 = vpop.f32.mrb[14].mxu1  ;;  %1868 = vmatprep.mubr.bf16.mxu1 %v1057_v3 }
 0x1c6   :  { %v1750_v29 = vpop.f32.mrb[15].mxu0  ;;  %v1822_v12 = vpop.f32.mrb[15].mxu1 }
 0x1c7   :  { %v1751_v13 = vadd.f32 %v1750_v29, %v1749_v10  ;;  %v1823_v14 = vadd.f32 %v1822_v12, %v1821_v11  ;;  %v1029_v16 = vmul.f32 %v1748_v8, %v2466_v31  ;;  %v2523_v17 = vmul.f32 %v1820_v9, %v1016_v30 }
 0x1c9   :  { %v1030_v18 = vmul.f32 %v1751_v13, %v2468_v32  ;;  %v2526_v19 = vmul.f32 %v1823_v14, %v1021_v15 }
 0x1cb   :  { %v1752_v21 = vpop.f32.mrb[16].mxu0  ;;  %v1058_v23 = vpack.c.bf16 %v1030_v18, %v1029_v16  ;;  %v1070_v24 = vpack.c.bf16 %v2526_v19, %v2523_v17 }
 0x1cc   :  { %v1753_v25 = vpop.f32.mrb[17].mxu0 }
 0x1cd   :  { %v1754_v49 = vadd.f32 %v1753_v25, %v1752_v21  ;;  %v1755_v50 = vpop.f32.mrb[18].mxu0  ;;  %1869 = vmatmul.mubr.bf16.gmra.mrb[20].mxu1 %v1058_v23 }
 0x1ce   :  { %v1756_v51 = vpop.f32.mrb[19].mxu0 }
 0x1cf   :  { %v1757_v52 = vadd.f32 %v1756_v51, %v1755_v50  ;;  %v1031_v53 = vmul.f32 %v1754_v49, %v2470_v33 }
 0x1d1   :  { %v1032_v31 = vmul.f32 %v1757_v52, %v2472_v34 }
 0x1d3   :  { %v1758_v54 = vpop.f32.mrb[20].mxu0  ;;  %v1059_v55 = vpack.c.bf16 %v1032_v31, %v1031_v53 }
 0x1d4   :  { %v1759_v32 = vpop.f32.mrb[21].mxu0 }
 0x1d5   :  { %v1760_v27 = vadd.f32 %v1759_v32, %v1758_v54  ;;  %v1761_v56 = vpop.f32.mrb[22].mxu0  ;;  %1872 = vmatprep.mubr.bf16.mxu1 %v1059_v55 }
 0x1d6   :  { %v1762_v57 = vpop.f32.mrb[23].mxu0 }
 0x1d7   :  { %v1763_v28 = vadd.f32 %v1762_v57, %v1761_v56  ;;  %v1033_v58 = vmul.f32 %v1760_v27, %v2474_v35 }
 0x1d9   :  { %v1034_v59 = vmul.f32 %v1763_v28, %v2476_v36 }
 0x1db   :  { %v1764_v61 = vpop.f32.mrb[24].mxu0  ;;  %v1060_v63 = vpack.c.bf16 %v1034_v59, %v1033_v58 }
 0x1dc   :  { %v1765_v1 = vpop.f32.mrb[25].mxu0 }
 0x1dd   :  { %v1766_v3 = vadd.f32 %v1765_v1, %v1764_v61  ;;  %v1767_v5 = vpop.f32.mrb[26].mxu0  ;;  %1873 = vmatmul.mubr.bf16.gmra.mrb[24].mxu1 %v1060_v63 }
 0x1de   :  { %v1768_v33 = vpop.f32.mrb[27].mxu0 }
 0x1df   :  { %v1769_v34 = vadd.f32 %v1768_v33, %v1767_v5  ;;  %v1035_v7 = vmul.f32 %v1766_v3, %v2478_v37 }
 0x1e1   :  { %v1036_v8 = vmul.f32 %v1769_v34, %v2480_v38 }
 0x1e3   :  { %v1770_v9 = vpop.f32.mrb[28].mxu0  ;;  %v1061_v10 = vpack.c.bf16 %v1036_v8, %v1035_v7 }
 0x1e4   :  { %v1771_v11 = vpop.f32.mrb[29].mxu0 }
 0x1e5   :  { %v1772_v29 = vadd.f32 %v1771_v11, %v1770_v9  ;;  %v1773_v12 = vpop.f32.mrb[30].mxu0  ;;  %1876 = vmatprep.mubr.bf16.mxu1 %v1061_v10 }
 0x1e6   :  { %v1774_v35 = vpop.f32.mrb[31].mxu0 }
 0x1e7   :  { %v1775_v36 = vadd.f32 %v1774_v35, %v1773_v12  ;;  %v1037_v13 = vmul.f32 %v1772_v29, %v2482_v39 }
 0x1e9   :  { %v1038_v14 = vmul.f32 %v1775_v36, %v2484_v40 }
 0x1eb   :  { %v1776_v30 = vpop.f32.mrb[32].mxu0  ;;  %v1062_v15 = vpack.c.bf16 %v1038_v14, %v1037_v13 }
 0x1ec   :  { %v1777_v16 = vpop.f32.mrb[33].mxu0 }
 0x1ed   :  { %v1778_v18 = vadd.f32 %v1777_v16, %v1776_v30  ;;  %v1779_v21 = vpop.f32.mrb[34].mxu0  ;;  %1877 = vmatmul.mubr.bf16.gmra.mrb[28].mxu1 %v1062_v15 }
 0x1ee   :  { %v1780_v37 = vpop.f32.mrb[35].mxu0 }
 0x1ef   :  { %v1781_v38 = vadd.f32 %v1780_v37, %v1779_v21  ;;  %v1039_v23 = vmul.f32 %v1778_v18, %v2486_v41 }
 0x1f1   :  { %v1040_v25 = vmul.f32 %v1781_v38, %v2488_v42 }
 0x1f3   :  { %v1782_v49 = vpop.f32.mrb[36].mxu0  ;;  %v1063_v50 = vpack.c.bf16 %v1040_v25, %v1039_v23 }
 0x1f4   :  { %v1783_v51 = vpop.f32.mrb[37].mxu0 }
 0x1f5   :  { %v1784_v52 = vadd.f32 %v1783_v51, %v1782_v49  ;;  %v1785_v53 = vpop.f32.mrb[38].mxu0  ;;  %1880 = vmatprep.mubr.bf16.mxu1 %v1063_v50 }
 0x1f6   :  { %v1786_v39 = vpop.f32.mrb[39].mxu0 }
 0x1f7   :  { %v1787_v40 = vadd.f32 %v1786_v39, %v1785_v53  ;;  %v1041_v31 = vmul.f32 %v1784_v52, %v2490_v43 }
 0x1f9   :  { %v1042_v54 = vmul.f32 %v1787_v40, %v2492_v44 }
 0x1fb   :  { %v1788_v55 = vpop.f32.mrb[40].mxu0  ;;  %v1064_v32 = vpack.c.bf16 %v1042_v54, %v1041_v31 }
 0x1fc   :  { %v1789_v27 = vpop.f32.mrb[41].mxu0 }
 0x1fd   :  { %v1790_v56 = vadd.f32 %v1789_v27, %v1788_v55  ;;  %v1791_v57 = vpop.f32.mrb[42].mxu0  ;;  %1881 = vmatmul.mubr.bf16.gmra.mrb[32].mxu1 %v1064_v32 }
 0x1fe   :  { %v1792_v41 = vpop.f32.mrb[43].mxu0 }
 0x1ff   :  { %v1793_v42 = vadd.f32 %v1792_v41, %v1791_v57  ;;  %v1043_v28 = vmul.f32 %v1790_v56, %v2494_v45  ;;  %v2561_v45 = vld [vmem:[%s2615_s5] ss:$0 sm:$0xff]  ;;  %s2027_s5 = smov [#allocation6]  }
 0x200   :  { %s1500_s21 = sshll.u32 %s2027_s5, 4  ;;  %s1501_s21 = int_to_ptr.vmem [resolvable:$true] %s1500_s21 }
 0x201   :  { %v1044_v58 = vmul.f32 %v1793_v42, %v2496_v46  ;;  %s1997_s22 = scalar_lea.vmem %s1501_s21, 2048  ;;  %p2002_p9 = scmp.lt.s32.totalorder %s1501_s21, %s1501_s21 }
 0x202   :  { %p1998_p8 = scmp.ne.s32.totalorder %s1501_s21, %s1997_s22  ;;  %p2003_p10 = scmp.lt.s32.totalorder %s1997_s22, %s1997_s22 }
 0x203   :  { %v1794_v59 = vpop.f32.mrb[44].mxu0  ;;  %v1065_v61 = vpack.c.bf16 %v1044_v58, %v1043_v28 }
 0x204   :  { %v1795_v63 = vpop.f32.mrb[45].mxu0  ;;  %p2004_p11 = por %p2003_p10, %p2002_p9 }
 0x205   :  { %v1796_v1 = vadd.f32 %v1795_v63, %v1794_v59  ;;  %v1797_v3 = vpop.f32.mrb[46].mxu0  ;;  %1884 = vmatprep.mubr.bf16.mxu1 %v1065_v61 }
 0x206   :  { %v1798_v43 = vpop.f32.mrb[47].mxu0  ;;  %p2005_p12 = pnand %p2004_p11, %p1998_p8 }
 0x207   :  { %v1799_v44 = vadd.f32 %v1798_v43, %v1797_v3  ;;  %v1045_v5 = vmul.f32 %v1796_v1, %v2498_v47 }
 0x209   :  { %v1046_v33 = vmul.f32 %v1799_v44, %v2500_v48 }
 0x20b   :  { %v1066_v34 = vpack.c.bf16 %v1046_v33, %v1045_v5 }
 0x20d   :  { %1885 = vmatmul.mubr.bf16.gmra.mrb[36].mxu1 %v1066_v34 }
 0x20e   :  { %1888 = vmatprep.mubr.bf16.mxu1 %v1067_v6 }
 0x215   :  { %1889 = vmatmul.mubr.bf16.gmra.mrb[40].mxu1 %v1068_v26 }
 0x216   :  { %1892 = vmatprep.mubr.bf16.mxu1 %v1069_v4 }
 0x21d   :  { %1893 = vmatmul.mubr.bf16.gmra.mrb[44].mxu1 %v1070_v24 }
 0x290   :  { %v1866_v46 = vpop.f32.mrb[16].mxu1 }
 0x291   :  { %v1185_v47 = vadd.f32 %v1866_v46, %v2561_v45  ;;  %v1176_v48 = vpop.f32.mrb[17].mxu1 }
 0x292   :  { %v1177_v0 = vadd.f32 %v2561_v45, %v1176_v48  ;;  %v1867_v2 = vpop.f32.mrb[18].mxu1 }
 0x293   :  { %v1188_v6 = vadd.f32 %v1867_v2, %v2561_v45  ;;  %v1179_v20 = vpop.f32.mrb[19].mxu1  ;;  %v1305_v26 = vmax.f32 %v1185_v47, 0.0 }
 0x294   :  { %v1180_v22 = vadd.f32 %v2561_v45, %v1179_v20  ;;  %v1303_v62 = vmax.f32 %v1177_v0, 0.0 }
 0x295   :  { %v1306_v60 = vmax.f32 %v1188_v6, 0.0 }
 0x296   :  { %v1304_v4 = vmax.f32 %v1180_v22, 0.0 }
 0x297   :  { %v1625_v17 = vpack.c.bf16 %v1306_v60, %v1305_v26 }
 0x298   :  { %v1620_v19 = vpack.c.bf16 %v1304_v4, %v1303_v62 }
 0x299   :  { %1697 = vst [vmem:[#allocation6 + $0x8] sm:$0xff] %v1625_v17  }
 0x29a   :  { %1621 = vst [vmem:[#allocation6] sm:$0xff] %v1620_v19  }
 0x2a0   :  { %v1870_v24 = vpop.f32.mrb[20].mxu1 }
 0x2a1   :  { %v1201_v7 = vadd.f32 %v1870_v24, %v2561_v45  ;;  %v1192_v8 = vpop.f32.mrb[21].mxu1 }
 0x2a2   :  { %v1193_v9 = vadd.f32 %v2561_v45, %v1192_v8  ;;  %v1871_v10 = vpop.f32.mrb[22].mxu1 }
 0x2a3   :  { %v1204_v11 = vadd.f32 %v1871_v10, %v2561_v45  ;;  %v1195_v29 = vpop.f32.mrb[23].mxu1  ;;  %v1309_v35 = vmax.f32 %v1201_v7, 0.0 }
 0x2a4   :  { %v1196_v12 = vadd.f32 %v2561_v45, %v1195_v29  ;;  %v1307_v13 = vmax.f32 %v1193_v9, 0.0 }
 0x2a5   :  { %v1310_v36 = vmax.f32 %v1204_v11, 0.0 }
 0x2a6   :  { %v1308_v14 = vmax.f32 %v1196_v12, 0.0 }
 0x2a7   :  { %v1635_v30 = vpack.c.bf16 %v1310_v36, %v1309_v35 }
 0x2a8   :  { %v1630_v15 = vpack.c.bf16 %v1308_v14, %v1307_v13 }
 0x2a9   :  { %1699 = vst [vmem:[#allocation6 + $0x18] sm:$0xff] %v1635_v30  }
 0x2aa   :  { %1698 = vst [vmem:[#allocation6 + $0x10] sm:$0xff] %v1630_v15  }
 0x2b0   :  { %v1874_v16 = vpop.f32.mrb[24].mxu1 }
 0x2b1   :  { %v1217_v18 = vadd.f32 %v1874_v16, %v2561_v45  ;;  %v1208_v21 = vpop.f32.mrb[25].mxu1 }
 0x2b2   :  { %v1209_v37 = vadd.f32 %v2561_v45, %v1208_v21  ;;  %v1875_v38 = vpop.f32.mrb[26].mxu1 }
 0x2b3   :  { %v1220_v23 = vadd.f32 %v1875_v38, %v2561_v45  ;;  %v1211_v25 = vpop.f32.mrb[27].mxu1  ;;  %v1313_v50 = vmax.f32 %v1217_v18, 0.0 }
 0x2b4   :  { %v1212_v49 = vadd.f32 %v2561_v45, %v1211_v25  ;;  %v1311_v52 = vmax.f32 %v1209_v37, 0.0 }
 0x2b5   :  { %v1314_v51 = vmax.f32 %v1220_v23, 0.0 }
 0x2b6   :  { %v1312_v53 = vmax.f32 %v1212_v49, 0.0 }
 0x2b7   :  { %v1645_v39 = vpack.c.bf16 %v1314_v51, %v1313_v50 }
 0x2b8   :  { %v1640_v40 = vpack.c.bf16 %v1312_v53, %v1311_v52 }
 0x2b9   :  { %1701 = vst [vmem:[#allocation6 + $0x28] sm:$0xff] %v1645_v39  }
 0x2ba   :  { %1700 = vst [vmem:[#allocation6 + $0x20] sm:$0xff] %v1640_v40  }
 0x2c0   :  { %v1878_v31 = vpop.f32.mrb[28].mxu1 }
 0x2c1   :  { %v1233_v54 = vadd.f32 %v1878_v31, %v2561_v45  ;;  %v1224_v55 = vpop.f32.mrb[29].mxu1 }
 0x2c2   :  { %v1225_v32 = vadd.f32 %v2561_v45, %v1224_v55  ;;  %v1879_v27 = vpop.f32.mrb[30].mxu1 }
 0x2c3   :  { %v1236_v56 = vadd.f32 %v1879_v27, %v2561_v45  ;;  %v1227_v57 = vpop.f32.mrb[31].mxu1  ;;  %v1317_v42 = vmax.f32 %v1233_v54, 0.0 }
 0x2c4   :  { %v1228_v41 = vadd.f32 %v2561_v45, %v1227_v57  ;;  %v1315_v58 = vmax.f32 %v1225_v32, 0.0 }
 0x2c5   :  { %v1318_v28 = vmax.f32 %v1236_v56, 0.0 }
 0x2c6   :  { %v1316_v59 = vmax.f32 %v1228_v41, 0.0 }
 0x2c7   :  { %v1655_v61 = vpack.c.bf16 %v1318_v28, %v1317_v42 }
 0x2c8   :  { %v1650_v63 = vpack.c.bf16 %v1316_v59, %v1315_v58 }
 0x2c9   :  { %1703 = vst [vmem:[#allocation6 + $0x38] sm:$0xff] %v1655_v61  }
 0x2ca   :  { %1702 = vst [vmem:[#allocation6 + $0x30] sm:$0xff] %v1650_v63  }
 0x2d0   :  { %v1882_v1 = vpop.f32.mrb[32].mxu1 }
 0x2d1   :  { %v1249_v3 = vadd.f32 %v1882_v1, %v2561_v45  ;;  %v1240_v43 = vpop.f32.mrb[33].mxu1 }
 0x2d2   :  { %v1241_v44 = vadd.f32 %v2561_v45, %v1240_v43  ;;  %v1883_v5 = vpop.f32.mrb[34].mxu1 }
 0x2d3   :  { %v1252_v33 = vadd.f32 %v1883_v5, %v2561_v45  ;;  %v1243_v34 = vpop.f32.mrb[35].mxu1  ;;  %v1321_v47 = vmax.f32 %v1249_v3, 0.0 }
 0x2d4   :  { %v1244_v46 = vadd.f32 %v2561_v45, %v1243_v34  ;;  %v1319_v0 = vmax.f32 %v1241_v44, 0.0 }
 0x2d5   :  { %v1322_v48 = vmax.f32 %v1252_v33, 0.0 }
 0x2d6   :  { %v1320_v2 = vmax.f32 %v1244_v46, 0.0 }
 0x2d7   :  { %v1665_v6 = vpack.c.bf16 %v1322_v48, %v1321_v47 }
 0x2d8   :  { %v1660_v20 = vpack.c.bf16 %v1320_v2, %v1319_v0 }
 0x2d9   :  { %1705 = vst [vmem:[#allocation6 + $0x48] sm:$0xff] %v1665_v6  }
 0x2da   :  { %1704 = vst [vmem:[#allocation6 + $0x40] sm:$0xff] %v1660_v20  }
 0x2e0   :  { %v1886_v22 = vpop.f32.mrb[36].mxu1 }
 0x2e1   :  { %v1265_v26 = vadd.f32 %v1886_v22, %v2561_v45  ;;  %v1256_v60 = vpop.f32.mrb[37].mxu1 }
 0x2e2   :  { %v1257_v62 = vadd.f32 %v2561_v45, %v1256_v60  ;;  %v1887_v4 = vpop.f32.mrb[38].mxu1 }
 0x2e3   :  { %v1268_v17 = vadd.f32 %v1887_v4, %v2561_v45  ;;  %v1259_v19 = vpop.f32.mrb[39].mxu1  ;;  %v1325_v7 = vmax.f32 %v1265_v26, 0.0 }
 0x2e4   :  { %v1260_v24 = vadd.f32 %v2561_v45, %v1259_v19  ;;  %v1323_v9 = vmax.f32 %v1257_v62, 0.0 }
 0x2e5   :  { %v1326_v8 = vmax.f32 %v1268_v17, 0.0 }
 0x2e6   :  { %v1324_v10 = vmax.f32 %v1260_v24, 0.0 }
 0x2e7   :  { %v1675_v11 = vpack.c.bf16 %v1326_v8, %v1325_v7 }
 0x2e8   :  { %v1670_v29 = vpack.c.bf16 %v1324_v10, %v1323_v9  ;;  %v1890_v12 = vpop.f32.mrb[40].mxu1 }
 0x2e9   :  { %1707 = vst [vmem:[#allocation6 + $0x58] sm:$0xff] %v1675_v11   ;;  %v1281_v35 = vadd.f32 %v1890_v12, %v2561_v45  ;;  %v1272_v36 = vpop.f32.mrb[41].mxu1 }
 0x2ea   :  { %1706 = vst [vmem:[#allocation6 + $0x50] sm:$0xff] %v1670_v29   ;;  %v1273_v13 = vadd.f32 %v2561_v45, %v1272_v36  ;;  %v1891_v14 = vpop.f32.mrb[42].mxu1 }
 0x2eb   :  { %v1284_v30 = vadd.f32 %v1891_v14, %v2561_v45  ;;  %v1275_v15 = vpop.f32.mrb[43].mxu1  ;;  %v1329_v18 = vmax.f32 %v1281_v35, 0.0 }
 0x2ec   :  { %v1276_v16 = vadd.f32 %v2561_v45, %v1275_v15  ;;  %v1327_v37 = vmax.f32 %v1273_v13, 0.0 }
 0x2ed   :  { %v1330_v21 = vmax.f32 %v1284_v30, 0.0 }
 0x2ee   :  { %v1328_v38 = vmax.f32 %v1276_v16, 0.0 }
 0x2ef   :  { %v1685_v23 = vpack.c.bf16 %v1330_v21, %v1329_v18 }
 0x2f0   :  { %v1680_v25 = vpack.c.bf16 %v1328_v38, %v1327_v37  ;;  %v1894_v49 = vpop.f32.mrb[44].mxu1 }
 0x2f1   :  { %1709 = vst [vmem:[#allocation6 + $0x68] sm:$0xff] %v1685_v23   ;;  %v1297_v50 = vadd.f32 %v1894_v49, %v2561_v45  ;;  %v1288_v51 = vpop.f32.mrb[45].mxu1 }
 0x2f2   :  { %1708 = vst [vmem:[#allocation6 + $0x60] sm:$0xff] %v1680_v25   ;;  %v1289_v52 = vadd.f32 %v2561_v45, %v1288_v51  ;;  %v1895_v53 = vpop.f32.mrb[46].mxu1 }
 0x2f3   :  { %v1300_v39 = vadd.f32 %v1895_v53, %v2561_v45  ;;  %v1291_v40 = vpop.f32.mrb[47].mxu1  ;;  %v1333_v54 = vmax.f32 %v1297_v50, 0.0 }
 0x2f4   :  { %v1292_v31 = vadd.f32 %v2561_v45, %v1291_v40  ;;  %v1331_v32 = vmax.f32 %v1289_v52, 0.0 }
 0x2f5   :  { %v1334_v55 = vmax.f32 %v1300_v39, 0.0 }
 0x2f6   :  { %v1332_v27 = vmax.f32 %v1292_v31, 0.0 }
 0x2f7   :  { %v1695_v56 = vpack.c.bf16 %v1334_v55, %v1333_v54 }
 0x2f8   :  { %v1690_v57 = vpack.c.bf16 %v1332_v27, %v1331_v32 }
 0x2f9   :  { %1711 = vst [vmem:[#allocation6 + $0x78] sm:$0xff] %v1695_v56  }
 0x2fa   :  { %1710 = vst [vmem:[#allocation6 + $0x70] sm:$0xff] %v1690_v57  }
 0x2fb   :  { %2008 = shalt.err (!%p2005_p12)
}
 0x2fc   :  { %s2009_s25 = scalar_lea.hbm %s2616_s6, 2048 }
 0x2fd   :  { %p2010_p13 = scmp.ne.s32.totalorder %s2616_s6, %s2009_s25  ;;  %p2013_p0 = scmp.lt.u32.totalorder %s2009_s25, %s2616_s6 }
 0x2ff   :  { %p2015_p1 = pnand %p2013_p0, %p2010_p13 }
 0x301   :  { %2018 = shalt.err (!%p2015_p1)
}
 0x302   :  { %1506 = dma.vmem_to_hbm [thread:$0]  %s1501_s21, 2048, %s2616_s6, [#allocation5], %s2024_s7, %s2024_s7, %s2025_s8  }
 0x303   :  { %2021 = dma.done.wait [#allocation5], 2048  }
 0x304   :  { %2022 = vsyncadd [#allocation5], 4294965248 }
 0x305   :  { %1510 = vsyncpa [#allocation4], 1 }
 0x306   :  { %1511 = vsyncpa [#allocation5], 1 }

</bundles_post_ra>
